<compile_context>
chip_gen: v5e
topology: v5e:2x2
jax: 0.10.0
libtpu: 0.0.40
codegen_flags: <defaults>
</compile_context>

<pallas_src>
import functools

import jax
import jax.numpy as jnp
from jax.experimental import pallas as pl
from jax.experimental.pallas import tpu as pltpu


def _round_up(x: int, m: int) -> int:
    return ((x + m - 1) // m) * m


# Row alignment of 16 keeps every static slab slice tile-aligned for BOTH the
# f32 (8,128) and bf16 (16,128) VMEM tilings.
_ROW_ALIGN = 16
_BIAS_STRIDE = 16


def _policy_kernel(obs_ref, slab_ref, out_ref, *, s, sp, w, ap):
    """One batch tile through the whole 3-layer MLP.

    Slab layout (row offsets are multiples of 16, lane width w is a multiple
    of 128, so every static slice below is tile-aligned):
      rows [0      , sp     ) : W1  (state_dim->s rows used, zero padded to sp)
      rows [sp     , sp+w   ) : W2  (hidden->w  x  hidden->w)
      rows [sp+w   , sp+2w  ) : W3  (hidden->w  x  act_dim, only :ap lanes used)
      row   sp+2w             : b1
      row   sp+2w+16          : b2
      row   sp+2w+32          : b3
    Zero padding keeps the math exact: padded lanes/rows contribute 0.
    """
    cdt = slab_ref.dtype                          # MXU operand dtype (bf16/f32)

    x = obs_ref[...]                              # [tm, s] already in cdt

    w1 = slab_ref[0:s, :]                         # [s, w]  (K = true state_dim)
    w2 = slab_ref[sp:sp + w, :]                   # [w, w]
    w3 = slab_ref[sp + w:sp + 2 * w, :ap]         # [w, ap] narrowed layer 3
    boff = sp + 2 * w
    b1 = slab_ref[boff:boff + 1, :].astype(jnp.float32)                       # [1, w]
    b2 = slab_ref[boff + _BIAS_STRIDE:boff + _BIAS_STRIDE + 1, :].astype(jnp.float32)
    b3 = slab_ref[boff + 2 * _BIAS_STRIDE:boff + 2 * _BIAS_STRIDE + 1, :ap].astype(jnp.float32)

    # layer 1: Linear + ReLU (MXU matmul, f32 accumulation, f32 epilogue)
    h = jnp.dot(x, w1, preferred_element_type=jnp.float32) + b1
    h = jnp.maximum(h, 0.0)
    # layer 2: Linear + ReLU
    h = jnp.dot(h.astype(cdt), w2, preferred_element_type=jnp.float32) + b2
    h = jnp.maximum(h, 0.0)
    # layer 3: Linear (already only ap lanes) + Tanh (EUP slot, hidden under MXU)
    o = jnp.dot(h.astype(cdt), w3, preferred_element_type=jnp.float32) + b3
    ow = out_ref.shape[-1]                        # a (masked store) or ap (unmasked)
    out_ref[...] = jnp.tanh(o[:, :ow]).astype(out_ref.dtype)


def pack_params(params, compute_dtype=jnp.bfloat16):
    """Pack (w1,b1,w2,b2,w3,b3) into a single zero-padded [R, W] slab."""
    w1, b1, w2, b2, w3, b3 = params
    s, h = w1.shape
    a = w3.shape[1]
    sp = _round_up(s, _ROW_ALIGN)                 # 16-aligned rows (bf16 safe)
    w = _round_up(max(h, a), 128)                 # common lane width
    ap = _round_up(a, 128)                        # padded act lane width
    r = sp + 2 * w + 3 * _BIAS_STRIDE
    slab = jnp.zeros((r, w), compute_dtype)
    slab = slab.at[:s, :h].set(w1.astype(compute_dtype))
    slab = slab.at[sp:sp + h, :h].set(w2.astype(compute_dtype))
    slab = slab.at[sp + w:sp + w + h, :a].set(w3.astype(compute_dtype))
    boff = sp + 2 * w
    slab = slab.at[boff, :h].set(b1.reshape(-1).astype(compute_dtype))
    slab = slab.at[boff + _BIAS_STRIDE, :h].set(b2.reshape(-1).astype(compute_dtype))
    slab = slab.at[boff + 2 * _BIAS_STRIDE, :a].set(b3.reshape(-1).astype(compute_dtype))
    return slab, dict(s=s, sp=sp, h=h, a=a, w=w, ap=ap, r=r)


def deterministic_policy_forward(obs, params, *, block_rows=512, mxu_bf16=True,
                                 out_dtype=jnp.float32, padded_output=False):
    """obs: [B, state_dim] -> tanh-squashed actions [B, act_dim] (out_dtype).

    padded_output=True returns [B, round_up(act_dim,128)] with an unmasked
    128-lane store (preferred on v5e when the consumer tolerates padding).
    """
    compute_dtype = jnp.bfloat16 if mxu_bf16 else jnp.float32
    slab, d = pack_params(params, compute_dtype)
    s, sp, a, w, ap, r = d["s"], d["sp"], d["a"], d["w"], d["ap"], d["r"]
    ow = ap if padded_output else a

    b = obs.shape[0]
    # Wrapper-side cast only (no pad / no output slice -> no extra HBM passes).
    obs = obs.astype(compute_dtype)

    # Batch tile: multiple of 16 so bf16 blocks satisfy the (16,128) tiling.
    tm = _round_up(min(block_rows, b), _ROW_ALIGN)
    n_steps = pl.cdiv(b, tm)
    # Best-effort even step count keeps both v7x TensorCores busy/balanced.
    if b >= 256 and n_steps % 2 == 1:
        n_steps += 1
        tm = _round_up(pl.cdiv(b, n_steps), _ROW_ALIGN)
        n_steps = pl.cdiv(b, tm)
    grid = (n_steps,)

    # --- VMEM budget: always set the scoped limit (v5e default is only 16 MiB).
    it_c = jnp.dtype(compute_dtype).itemsize
    it_o = jnp.dtype(out_dtype).itemsize
    vmem_est = (2 * r * w * it_c          # slab (worst case: double-buffered fallback)
                + 2 * tm * s * it_c       # double-buffered obs tiles
                + 2 * tm * ow * it_o      # double-buffered out tiles
                + 8 * tm * w * 4)         # live f32 intermediates headroom
    try:
        vmem_cap = int(pltpu.get_tpu_info().vmem_capacity_bytes)
    except Exception:
        vmem_cap = 64 << 20               # v7x per-TC capacity: safe lower bound
    vmem_limit = int(min(max(vmem_est + (8 << 20), 32 << 20),
                         min(vmem_cap - (8 << 20), 100 << 20)))

    cost = pl.CostEstimate(
        flops=2 * b * (s * w + w * w + w * ap),
        transcendentals=b * ap,
        bytes_accessed=b * s * it_c + b * ow * it_o + r * w * it_c,
    )

    kernel = functools.partial(_policy_kernel, s=s, sp=sp, w=w, ap=ap)
    obs_spec = pl.BlockSpec((tm, s), lambda i: (i, 0))       # streamed batch tile
    out_spec = pl.BlockSpec((tm, ow), lambda i: (i, 0))      # lane-dense / full-dim store
    cparams = pltpu.CompilerParams(dimension_semantics=("parallel",),
                                   vmem_limit_bytes=vmem_limit)

    def _call(slab_spec):
        return pl.pallas_call(
            kernel,
            out_shape=jax.ShapeDtypeStruct((b, ow), out_dtype),
            grid=grid,
            in_specs=[obs_spec, slab_spec],
            out_specs=out_spec,
            compiler_params=cparams,
            cost_estimate=cost,
        )(obs, slab)

    try:
        # Constant index_map -> weights stay resident; single-buffer the slab
        # so it costs r*w bytes instead of 2*r*w (critical on v7x @ 64 MiB).
        return _call(pl.BlockSpec((r, w), lambda i: (0, 0),
                                  pipeline_mode=pl.Buffered(1)))
    except Exception:
        # Fallback (eager path): default double-buffered resident slab.
        return _call(pl.BlockSpec((r, w), lambda i: (0, 0)))


def init_params(key, state_dim, hidden_dim, act_dim):
    """Deterministic PyTorch-style (Kaiming-uniform-ish) init."""
    def linear(key, fan_in, fan_out):
        kw, kb = jax.random.split(key)
        bound = 1.0 / jnp.sqrt(fan_in)
        wgt = jax.random.uniform(kw, (fan_in, fan_out), jnp.float32, -bound, bound)
        bias = jax.random.uniform(kb, (1, fan_out), jnp.float32, -bound, bound)
        return wgt, bias

    k1, k2, k3 = jax.random.split(key, 3)
    w1, b1 = linear(k1, state_dim, hidden_dim)
    w2, b2 = linear(k2, hidden_dim, hidden_dim)
    w3, b3 = linear(k3, hidden_dim, act_dim)
    return (w1, b1, w2, b2, w3, b3)


def reference_forward(obs, params):
    w1, b1, w2, b2, w3, b3 = params
    h = jnp.maximum(obs @ w1 + b1, 0.0)
    h = jnp.maximum(h @ w2 + b2, 0.0)
    return jnp.tanh(h @ w3 + b3)


if __name__ == "__main__":
    key = jax.random.PRNGKey(0)
    k_obs, k_par, k_obs2, k_par2 = jax.random.split(key, 4)

    # --- small case: f32 operands, exactness check ------------------------
    batch, state_dim, hidden_dim, act_dim = 2, 16, 32, 4
    obs = jax.random.normal(k_obs, (batch, state_dim), jnp.float32)
    params = init_params(k_par, state_dim, hidden_dim, act_dim)

    out = deterministic_policy_forward(obs, params, mxu_bf16=False)
    out = jax.block_until_ready(out)
    ref = reference_forward(obs, params)
    assert out.shape == (batch, act_dim)
    assert jnp.allclose(out, ref, atol=1e-5, rtol=1e-5), "small-case mismatch"

    # --- multi-tile case: ragged batch, module-default hidden_dim=256,
    #     default bf16 MXU operands with f32 accumulation ------------------
    batch2, state_dim2, hidden_dim2, act_dim2 = 300, 17, 256, 6
    obs2 = jax.random.normal(k_obs2, (batch2, state_dim2), jnp.float32)
    params2 = init_params(k_par2, state_dim2, hidden_dim2, act_dim2)
    out2 = deterministic_policy_forward(obs2, params2, block_rows=128)
    out2 = jax.block_until_ready(out2)
    ref2 = reference_forward(obs2, params2)
    assert out2.shape == (batch2, act_dim2)
    assert jnp.allclose(out2, ref2, atol=2e-2, rtol=2e-2), "tiled-case mismatch"

    print("KERNEL_OK")
</pallas_src>

<mosaic_0001>
module attributes {stable_mosaic.version = 11 : i64} {
  func.func @_policy_kernel(%arg0: i32, %arg1: memref<16x16xf32, #tpu.memory_space<vmem>>, %arg2: memref<320x128xf32, #tpu.memory_space<vmem>>, %arg3: memref<16x4xf32, #tpu.memory_space<vmem>>) attributes {dimension_semantics = [#tpu.dimension_semantics<parallel>], iteration_bounds = array<i64: 1>, scalar_prefetch = 0 : i64, scratch_operands = 0 : i64, tpu.core_type = #tpu.core_type<tc>, window_params = [{transform_indices = @transform_0, window_bounds = array<i64: 16, 16>}, {pipeline_mode = #tpu.pipeline_mode<synchronous>, transform_indices = @transform_1, window_bounds = array<i64: 320, 128>}, {transform_indices = @transform_2, window_bounds = array<i64: 16, 4>}]} {
    %c0 = arith.constant 0 : index
    %c0_0 = arith.constant 0 : index
    %0 = vector.load %arg1[%c0, %c0_0] : memref<16x16xf32, #tpu.memory_space<vmem>>, vector<16x16xf32>
    %c0_1 = arith.constant 0 : index
    %c0_2 = arith.constant 0 : index
    %1 = vector.load %arg2[%c0_1, %c0_2] : memref<320x128xf32, #tpu.memory_space<vmem>>, vector<16x128xf32>
    %c16 = arith.constant 16 : index
    %c0_3 = arith.constant 0 : index
    %2 = vector.load %arg2[%c16, %c0_3] : memref<320x128xf32, #tpu.memory_space<vmem>>, vector<128x128xf32>
    %c144 = arith.constant 144 : index
    %c0_4 = arith.constant 0 : index
    %3 = vector.load %arg2[%c144, %c0_4] : memref<320x128xf32, #tpu.memory_space<vmem>>, vector<128x128xf32>
    %c272 = arith.constant 272 : index
    %c0_5 = arith.constant 0 : index
    %4 = vector.load %arg2[%c272, %c0_5] : memref<320x128xf32, #tpu.memory_space<vmem>>, vector<1x128xf32>
    %c288 = arith.constant 288 : index
    %c0_6 = arith.constant 0 : index
    %5 = vector.load %arg2[%c288, %c0_6] : memref<320x128xf32, #tpu.memory_space<vmem>>, vector<1x128xf32>
    %c304 = arith.constant 304 : index
    %c0_7 = arith.constant 0 : index
    %6 = vector.load %arg2[%c304, %c0_7] : memref<320x128xf32, #tpu.memory_space<vmem>>, vector<1x128xf32>
    %cst = arith.constant dense<0.000000e+00> : vector<16x128xf32>
    %7 = tpu.matmul %0, %1, %cst {dimension_numbers = #tpu.dot_dimension_numbers<[1], [0], [0], [1], [0, 0, 1, 1], [], []>} : vector<16x16xf32>, vector<16x128xf32>, vector<16x128xf32> -> vector<16x128xf32>
    %8 = vector.broadcast %4 : vector<1x128xf32> to vector<16x128xf32>
    %9 = arith.addf %7, %8 : vector<16x128xf32>
    %cst_8 = arith.constant 0.000000e+00 : f32
    %10 = vector.broadcast %cst_8 : f32 to vector<16x128xf32>
    %11 = arith.maximumf %9, %10 : vector<16x128xf32>
    %cst_9 = arith.constant dense<0.000000e+00> : vector<16x128xf32>
    %12 = tpu.matmul %11, %2, %cst_9 {dimension_numbers = #tpu.dot_dimension_numbers<[1], [0], [0], [1], [0, 0, 1, 1], [], []>} : vector<16x128xf32>, vector<128x128xf32>, vector<16x128xf32> -> vector<16x128xf32>
    %13 = vector.broadcast %5 : vector<1x128xf32> to vector<16x128xf32>
    %14 = arith.addf %12, %13 : vector<16x128xf32>
    %cst_10 = arith.constant 0.000000e+00 : f32
    %15 = vector.broadcast %cst_10 : f32 to vector<16x128xf32>
    %16 = arith.maximumf %14, %15 : vector<16x128xf32>
    %cst_11 = arith.constant dense<0.000000e+00> : vector<16x128xf32>
    %17 = tpu.matmul %16, %3, %cst_11 {dimension_numbers = #tpu.dot_dimension_numbers<[1], [0], [0], [1], [0, 0, 1, 1], [], []>} : vector<16x128xf32>, vector<128x128xf32>, vector<16x128xf32> -> vector<16x128xf32>
    %18 = vector.broadcast %6 : vector<1x128xf32> to vector<16x128xf32>
    %19 = arith.addf %17, %18 : vector<16x128xf32>
    %20 = vector.extract_strided_slice %19 {offsets = [0, 0], sizes = [16, 4], strides = [1, 1]} : vector<16x128xf32> to vector<16x4xf32>
    %21 = math.tanh %20 : vector<16x4xf32>
    %c0_12 = arith.constant 0 : index
    %c0_13 = arith.constant 0 : index
    %22 = vector.load %arg3[%c0_12, %c0_13] : memref<16x4xf32, #tpu.memory_space<vmem>>, vector<16x4xf32>
    tpu.vector_store %arg3[%c0_12, %c0_13], %21 {strides = array<i32>} : memref<16x4xf32, #tpu.memory_space<vmem>>, vector<16x4xf32>,
    return
  }
  func.func @transform_0(%arg0: i32) -> (i32, i32) {
    %c0_i32 = arith.constant 0 : i32
    %c0_i32_0 = arith.constant 0 : i32
    return %arg0, %c0_i32 : i32, i32
  }
  func.func @transform_1(%arg0: i32) -> (i32, i32) {
    %c0_i32 = arith.constant 0 : i32
    %c0_i32_0 = arith.constant 0 : i32
    %c0_i32_1 = arith.constant 0 : i32
    return %c0_i32, %c0_i32_0 : i32, i32
  }
  func.func @transform_2(%arg0: i32) -> (i32, i32) {
    %c0_i32 = arith.constant 0 : i32
    %c0_i32_0 = arith.constant 0 : i32
    return %arg0, %c0_i32 : i32, i32
  }
}

module attributes {stable_mosaic.version = 11 : i64} {
  func.func @_policy_kernel(%arg0: i32, %arg1: memref<16x16xf32, #tpu.memory_space<vmem>>, %arg2: memref<320x128xf32, #tpu.memory_space<vmem>>, %arg3: memref<16x4xf32, #tpu.memory_space<vmem>>) attributes {dimension_semantics = [#tpu.dimension_semantics<parallel>], iteration_bounds = array<i64: 1>, scalar_prefetch = 0 : i64, scratch_operands = 0 : i64, tpu.core_type = #tpu.core_type<tc>, window_params = [{transform_indices = @transform_0, window_bounds = array<i64: 16, 16>}, {pipeline_mode = #tpu.pipeline_mode<synchronous>, transform_indices = @transform_1, window_bounds = array<i64: 320, 128>}, {transform_indices = @transform_2, window_bounds = array<i64: 16, 4>}]} {
    %c0 = arith.constant 0 : index
    %c0_0 = arith.constant 0 : index
    %0 = vector.load %arg1[%c0, %c0_0] : memref<16x16xf32, #tpu.memory_space<vmem>>, vector<16x16xf32>
    %c0_1 = arith.constant 0 : index
    %c0_2 = arith.constant 0 : index
    %1 = vector.load %arg2[%c0_1, %c0_2] : memref<320x128xf32, #tpu.memory_space<vmem>>, vector<16x128xf32>
    %c16 = arith.constant 16 : index
    %c0_3 = arith.constant 0 : index
    %2 = vector.load %arg2[%c16, %c0_3] : memref<320x128xf32, #tpu.memory_space<vmem>>, vector<128x128xf32>
    %c144 = arith.constant 144 : index
    %c0_4 = arith.constant 0 : index
    %3 = vector.load %arg2[%c144, %c0_4] : memref<320x128xf32, #tpu.memory_space<vmem>>, vector<128x128xf32>
    %c272 = arith.constant 272 : index
    %c0_5 = arith.constant 0 : index
    %4 = vector.load %arg2[%c272, %c0_5] : memref<320x128xf32, #tpu.memory_space<vmem>>, vector<1x128xf32>
    %c288 = arith.constant 288 : index
    %c0_6 = arith.constant 0 : index
    %5 = vector.load %arg2[%c288, %c0_6] : memref<320x128xf32, #tpu.memory_space<vmem>>, vector<1x128xf32>
    %c304 = arith.constant 304 : index
    %c0_7 = arith.constant 0 : index
    %6 = vector.load %arg2[%c304, %c0_7] : memref<320x128xf32, #tpu.memory_space<vmem>>, vector<1x128xf32>
    %cst = arith.constant dense<0.000000e+00> : vector<16x128xf32>
    %7 = tpu.matmul %0, %1, %cst {dimension_numbers = #tpu.dot_dimension_numbers<[1], [0], [0], [1], [0, 0, 1, 1], [], []>} : vector<16x16xf32>, vector<16x128xf32>, vector<16x128xf32> -> vector<16x128xf32>
    %8 = vector.broadcast %4 : vector<1x128xf32> to vector<16x128xf32>
    %9 = arith.addf %7, %8 : vector<16x128xf32>
    %cst_8 = arith.constant 0.000000e+00 : f32
    %10 = vector.broadcast %cst_8 : f32 to vector<16x128xf32>
    %11 = arith.maximumf %9, %10 : vector<16x128xf32>
    %cst_9 = arith.constant dense<0.000000e+00> : vector<16x128xf32>
    %12 = tpu.matmul %11, %2, %cst_9 {dimension_numbers = #tpu.dot_dimension_numbers<[1], [0], [0], [1], [0, 0, 1, 1], [], []>} : vector<16x128xf32>, vector<128x128xf32>, vector<16x128xf32> -> vector<16x128xf32>
    %13 = vector.broadcast %5 : vector<1x128xf32> to vector<16x128xf32>
    %14 = arith.addf %12, %13 : vector<16x128xf32>
    %cst_10 = arith.constant 0.000000e+00 : f32
    %15 = vector.broadcast %cst_10 : f32 to vector<16x128xf32>
    %16 = arith.maximumf %14, %15 : vector<16x128xf32>
    %cst_11 = arith.constant dense<0.000000e+00> : vector<16x128xf32>
    %17 = tpu.matmul %16, %3, %cst_11 {dimension_numbers = #tpu.dot_dimension_numbers<[1], [0], [0], [1], [0, 0, 1, 1], [], []>} : vector<16x128xf32>, vector<128x128xf32>, vector<16x128xf32> -> vector<16x128xf32>
    %18 = vector.broadcast %6 : vector<1x128xf32> to vector<16x128xf32>
    %19 = arith.addf %17, %18 : vector<16x128xf32>
    %20 = vector.extract_strided_slice %19 {offsets = [0, 0], sizes = [16, 4], strides = [1, 1]} : vector<16x128xf32> to vector<16x4xf32>
    %21 = math.tanh %20 : vector<16x4xf32>
    %c0_12 = arith.constant 0 : index
    %c0_13 = arith.constant 0 : index
    %22 = vector.load %arg3[%c0_12, %c0_13] : memref<16x4xf32, #tpu.memory_space<vmem>>, vector<16x4xf32>
    tpu.vector_store %arg3[%c0_12, %c0_13], %21 {strides = array<i32>} : memref<16x4xf32, #tpu.memory_space<vmem>>, vector<16x4xf32>,
    return
  }
  func.func @transform_0(%arg0: i32) -> (i32, i32) {
    %c0_i32 = arith.constant 0 : i32
    %c0_i32_0 = arith.constant 0 : i32
    return %arg0, %c0_i32 : i32, i32
  }
  func.func @transform_1(%arg0: i32) -> (i32, i32) {
    %c0_i32 = arith.constant 0 : i32
    %c0_i32_0 = arith.constant 0 : i32
    %c0_i32_1 = arith.constant 0 : i32
    return %c0_i32, %c0_i32_0 : i32, i32
  }
  func.func @transform_2(%arg0: i32) -> (i32, i32) {
    %c0_i32 = arith.constant 0 : i32
    %c0_i32_0 = arith.constant 0 : i32
    return %arg0, %c0_i32 : i32, i32
  }
}

</mosaic_0001>

<bundles_post_ra>
// kernel: tpu_custom_call.1
= control target key start
LH: loop header
LB: loop body
LE: loop exit
PB: predicated region body
PF: predicated region fallthrough
CT: control target
= control target key end

     0   :  { %7 = vsyncpa [#allocation3], 0  ;;  %s356_s0 = inlined_call_operand.hbm [shape: f32[2,16], index: 0, kind: input, shape index: {}]   ;;  %s357_s1 = inlined_call_operand.hbm [shape: f32[320,128], index: 1, kind: input, shape index: {}]   ;;  %s358_s2 = inlined_call_operand.hbm [shape: f32[2,4], index: 2, kind: output, shape index: {}]  }
   0x1   :  { %8 = vsyncpa [#allocation6], 0 }
   0x2   :  { %9 = vsyncpa [#allocation4], 0 }
   0x3   :  { %13 = vsyncadd [#allocation3], 224  ;;  %s14_s11 = sshll.u32 %s356_s0, 4  ;;  %s317_s12 = smov [#allocation2]   ;;  %s15_s11 = int_to_ptr.hbm [resolvable:$true] %s14_s11 }
   0x4   :  { %s16_s13 = sshll.u32 %s317_s12, 4  ;;  %s27_s16 = sshll.u32 %s357_s1, 4  ;;  %s17_s13 = int_to_ptr.vmem [resolvable:$true] %s16_s13  ;;  %s28_s16 = int_to_ptr.hbm [resolvable:$true] %s27_s16 }
   0x5   :  { %s318_s17 = smov 32   ;;  %s319_s18 = smov 2  }
   0x6   :  { %22 = dma.hbm_to_vmem [thread:$0]  %s15_s11, 32, %s17_s13, [#allocation3], %s318_s17, %s318_s17, %s319_s18  }
   0x7   :  { %s320_s19 = smov [#allocation5]   ;;  %s321_s21 = smov 128  }
   0x8   :  { %s29_s20 = sshll.u32 %s320_s19, 4  ;;  %s322_s0 = smov 8   ;;  %s30_s20 = int_to_ptr.vmem [resolvable:$true] %s29_s20 }
   0x9   :  { %35 = dma.hbm_to_vmem [thread:$0]  %s28_s16, 5120, %s30_s20, [#allocation6], %s321_s21, %s321_s21, %s322_s0  }
   0xa   :  { %311 = dma.done.wait [#allocation3], 256  }
   0xb   :  { %312 = vsyncadd [#allocation3], 4294967040 }
   0xc   :  { %313 = dma.done.wait [#allocation6], 5120  }
   0xd   :  { %314 = vsyncadd [#allocation6], 4294962176  ;;  %v47_v0 = vld [vmem:[#allocation5 + $0x8] sm:$0xff]  ;;  %v46_v1 = vld [vmem:[#allocation5] sm:$0xff]  ;;  %vm84_vm0 = vcmask 130048   ;;  %vm168_vm1 = vcmask 31744  }
   0xe   :  { %105 = vmatpush.msra.mxu0 %v47_v0  ;;  %v44_v2 = vld [vmem:[#allocation2] sm:$0xff]  ;;  %v63_v3 = vld [vmem:[#allocation5 + $0x88] sm:$0xff]  ;;  %v62_v4 = vld [vmem:[#allocation5 + $0x80] sm:$0xff] }
   0xf   :  { %117 = vmatpush.msra.mxu1 %v63_v3  ;;  %193 = vmatpush.msra.mxu3 %v63_v3  ;;  %v61_v5 = vld [vmem:[#allocation5 + $0x78] sm:$0xff]  ;;  %v60_v6 = vld [vmem:[#allocation5 + $0x70] sm:$0xff]  ;;  %v59_v7 = vld [vmem:[#allocation5 + $0x68] sm:$0xff] }
  0x10   :  { %106 = vmatpush.msra.mxu0 %v46_v1  ;;  %v45_v8 = vld [vmem:[#allocation2 + $0x8] sm:$0xff]  ;;  %v58_v9 = vld [vmem:[#allocation5 + $0x60] sm:$0xff]  ;;  %v56_v11 = vld [vmem:[#allocation5 + $0x50] sm:$0xff] }
  0x11   :  { %191 = vmatmul.msk.f32.vlgmr.msra.gmra.mxu0 %vm84_vm0, %v44_v2  ;;  %118 = vmatpush.msra.mxu1 %v62_v4  ;;  %v57_v10 = vld [vmem:[#allocation5 + $0x58] sm:$0xff]  ;;  %v55_v12 = vld [vmem:[#allocation5 + $0x48] sm:$0xff]  ;;  %v54_v13 = vld [vmem:[#allocation5 + $0x40] sm:$0xff] }
  0x12   :  { %194 = vmatpush.msra.mxu3 %v62_v4  ;;  %v53_v14 = vld [vmem:[#allocation5 + $0x38] sm:$0xff]  ;;  %v52_v15 = vld [vmem:[#allocation5 + $0x30] sm:$0xff]  ;;  %v51_v16 = vld [vmem:[#allocation5 + $0x28] sm:$0xff] }
  0x13   :  { %119 = vmatpush.msra.mxu1 %v61_v5  ;;  %v50_v17 = vld [vmem:[#allocation5 + $0x20] sm:$0xff]  ;;  %v49_v18 = vld [vmem:[#allocation5 + $0x18] sm:$0xff]  ;;  %v48_v19 = vld [vmem:[#allocation5 + $0x10] sm:$0xff] }
  0x14   :  { %195 = vmatpush.msra.mxu3 %v61_v5  ;;  %v79_v20 = vld [vmem:[#allocation5 + $0x108] sm:$0xff]  ;;  %v78_v21 = vld [vmem:[#allocation5 + $0x100] sm:$0xff]  ;;  %v77_v22 = vld [vmem:[#allocation5 + $0xf8] sm:$0xff] }
  0x15   :  { %120 = vmatpush.msra.mxu1 %v60_v6  ;;  %143 = vmatpush.msrb.mxu0 %v79_v20  ;;  %v76_v23 = vld [vmem:[#allocation5 + $0xf0] sm:$0xff]  ;;  %v75_v24 = vld [vmem:[#allocation5 + $0xe8] sm:$0xff]  ;;  %v74_v25 = vld [vmem:[#allocation5 + $0xe0] sm:$0xff] }
  0x16   :  { %196 = vmatpush.msra.mxu3 %v60_v6  ;;  %209 = vmatpush.msra.mxu2 %v79_v20  ;;  %v73_v26 = vld [vmem:[#allocation5 + $0xd8] sm:$0xff]  ;;  %v72_v27 = vld [vmem:[#allocation5 + $0xd0] sm:$0xff]  ;;  %v71_v28 = vld [vmem:[#allocation5 + $0xc8] sm:$0xff] }
  0x17   :  { %121 = vmatpush.msra.mxu1 %v59_v7  ;;  %144 = vmatpush.msrb.mxu0 %v78_v21  ;;  %v232_v29 = vld [vmem:[#allocation5 + $0x110] ss:$0 sm:$0xff]  ;;  %v70_v30 = vld [vmem:[#allocation5 + $0xc0] sm:$0xff]  ;;  %v69_v31 = vld [vmem:[#allocation5 + $0xb8] sm:$0xff] }
  0x18   :  { %197 = vmatpush.msra.mxu3 %v59_v7  ;;  %210 = vmatpush.msra.mxu2 %v78_v21  ;;  %v68_v34 = vld [vmem:[#allocation5 + $0xb0] sm:$0xff]  ;;  %v67_v36 = vld [vmem:[#allocation5 + $0xa8] sm:$0xff]  ;;  %v66_v40 = vld [vmem:[#allocation5 + $0xa0] sm:$0xff] }
  0x19   :  { %192 = vmatmul.msk.f32.gmra.mxu0 %vm84_vm0, %v45_v8  ;;  %122 = vmatpush.msra.mxu1 %v58_v9  ;;  %v65_v41 = vld [vmem:[#allocation5 + $0x98] sm:$0xff]  ;;  %v64_v42 = vld [vmem:[#allocation5 + $0x90] sm:$0xff]  ;;  %v233_v43 = vld [vmem:[#allocation5 + $0x120] ss:$0 sm:$0xff] }
  0x1a   :  { %198 = vmatpush.msra.mxu3 %v58_v9  ;;  %145 = vmatpush.msrb.mxu0 %v77_v22  ;;  %v234_v50 = vld [vmem:[#allocation5 + $0x130] ss:$0 sm:$0xff] }
  0x1b   :  { %123 = vmatpush.msra.mxu1 %v57_v10  ;;  %211 = vmatpush.msra.mxu2 %v77_v22 }
  0x1c   :  { %199 = vmatpush.msra.mxu3 %v57_v10  ;;  %146 = vmatpush.msrb.mxu0 %v76_v23 }
  0x1d   :  { %124 = vmatpush.msra.mxu1 %v56_v11  ;;  %212 = vmatpush.msra.mxu2 %v76_v23 }
  0x1e   :  { %200 = vmatpush.msra.mxu3 %v56_v11  ;;  %147 = vmatpush.msrb.mxu0 %v75_v24 }
  0x1f   :  { %125 = vmatpush.msra.mxu1 %v55_v12  ;;  %213 = vmatpush.msra.mxu2 %v75_v24 }
  0x20   :  { %201 = vmatpush.msra.mxu3 %v55_v12  ;;  %148 = vmatpush.msrb.mxu0 %v74_v25 }
  0x21   :  { %126 = vmatpush.msra.mxu1 %v54_v13  ;;  %214 = vmatpush.msra.mxu2 %v74_v25 }
  0x22   :  { %202 = vmatpush.msra.mxu3 %v54_v13  ;;  %149 = vmatpush.msrb.mxu0 %v73_v26 }
  0x23   :  { %127 = vmatpush.msra.mxu1 %v53_v14  ;;  %215 = vmatpush.msra.mxu2 %v73_v26 }
  0x24   :  { %203 = vmatpush.msra.mxu3 %v53_v14  ;;  %150 = vmatpush.msrb.mxu0 %v72_v27 }
  0x25   :  { %128 = vmatpush.msra.mxu1 %v52_v15  ;;  %216 = vmatpush.msra.mxu2 %v72_v27 }
  0x26   :  { %204 = vmatpush.msra.mxu3 %v52_v15  ;;  %151 = vmatpush.msrb.mxu0 %v71_v28 }
  0x27   :  { %129 = vmatpush.msra.mxu1 %v51_v16  ;;  %217 = vmatpush.msra.mxu2 %v71_v28 }
  0x28   :  { %205 = vmatpush.msra.mxu3 %v51_v16  ;;  %152 = vmatpush.msrb.mxu0 %v70_v30 }
  0x29   :  { %130 = vmatpush.msra.mxu1 %v50_v17  ;;  %218 = vmatpush.msra.mxu2 %v70_v30 }
  0x2a   :  { %206 = vmatpush.msra.mxu3 %v50_v17  ;;  %153 = vmatpush.msrb.mxu0 %v69_v31 }
  0x2b   :  { %131 = vmatpush.msra.mxu1 %v49_v18  ;;  %219 = vmatpush.msra.mxu2 %v69_v31 }
  0x2c   :  { %207 = vmatpush.msra.mxu3 %v49_v18  ;;  %154 = vmatpush.msrb.mxu0 %v68_v34 }
  0x2d   :  { %132 = vmatpush.msra.mxu1 %v48_v19  ;;  %220 = vmatpush.msra.mxu2 %v68_v34 }
  0x2e   :  { %208 = vmatpush.msra.mxu3 %v48_v19  ;;  %155 = vmatpush.msrb.mxu0 %v67_v36 }
  0x2f   :  { %221 = vmatpush.msra.mxu2 %v67_v36 }
  0x30   :  { %156 = vmatpush.msrb.mxu0 %v66_v40 }
  0x31   :  { %222 = vmatpush.msra.mxu2 %v66_v40 }
  0x32   :  { %157 = vmatpush.msrb.mxu0 %v65_v41 }
  0x33   :  { %223 = vmatpush.msra.mxu2 %v65_v41 }
  0x34   :  { %158 = vmatpush.msrb.mxu0 %v64_v42 }
  0x35   :  { %224 = vmatpush.msra.mxu2 %v64_v42 }
  0x8e   :  { %v108_v32 = vpop.f32.mrf.mxu0 }
  0x8f   :  { %v109_v33 = vadd.f32 %v232_v29, %v108_v32 }
  0x91   :  { %v114_v35 = vmax.f32 %v109_v33, 0.0 }
  0x93   :  { %133 = vmatmul.f32.vlgmr.msra.gmra.mxu1 %v114_v35 }
  0x96   :  { %v111_v37 = vpop.f32.mrf.mxu0 }
  0x97   :  { %v112_v38 = vadd.f32 %v232_v29, %v111_v37 }
  0x99   :  { %v115_v39 = vmax.f32 %v112_v38, 0.0 }
  0x9b   :  { %136 = vmatmul.f32.vlgmr.msra.gmra.mxu3 %v115_v39 }
 0x110   :  { %v134_v44 = vpop.f32.mrf.mxu1 }
 0x111   :  { %v135_v45 = vadd.f32 %v233_v43, %v134_v44 }
 0x113   :  { %v140_v46 = vmax.f32 %v135_v45, 0.0 }
 0x115   :  { %159 = vmatmul.f32.vlgmr.msrb.gmra.mxu0 %v140_v46 }
 0x11e   :  { %v137_v47 = vpop.f32.mrf.mxu3 }
 0x11f   :  { %v138_v48 = vadd.f32 %v233_v43, %v137_v47 }
 0x121   :  { %v141_v49 = vmax.f32 %v138_v48, 0.0 }
 0x123   :  { %162 = vmatmul.f32.vlgmr.msra.gmra.mxu2 %v141_v49 }
 0x192   :  { %v160_v51 = vpop.f32.mrf.mxu0 }
 0x193   :  { %v161_v52 = vadd.f32 %v234_v50, %v160_v51 }
 0x195   :  { %235 = vtanh.f32 %v161_v52 }
 0x19b   :  { %v236_v53 = vpop.eup %235 }
 0x19c   :  { %169 = vst.msk [vmem:[#allocation7] sm:$0xff] %vm168_vm1, %v236_v53 }
 0x1a6   :  { %v163_v54 = vpop.f32.mrf.mxu2 }
 0x1a7   :  { %v164_v55 = vadd.f32 %v234_v50, %v163_v54 }
 0x1a9   :  { %237 = vtanh.f32 %v164_v55 }
 0x1af   :  { %v238_v56 = vpop.eup %237 }
 0x1b0   :  { %170 = vst.msk [vmem:[#allocation7 + $0x8] sm:$0xff] %vm168_vm1, %v238_v56 }
 0x1b1   :  { %174 = vsyncadd [#allocation4], 224  ;;  %s177_s23 = sshll.u32 %s358_s2, 4  ;;  %s323_s24 = smov [#allocation7]   ;;  %s178_s23 = int_to_ptr.hbm [resolvable:$true] %s177_s23 }
 0x1b2   :  { %s175_s25 = sshll.u32 %s323_s24, 4  ;;  %s176_s25 = int_to_ptr.vmem [resolvable:$true] %s175_s25 }
 0x1b3   :  { %183 = dma.vmem_to_hbm [thread:$0]  %s176_s25, 32, %s178_s23, [#allocation4], %s318_s17, %s318_s17, %s319_s18  }
 0x1b4   :  { %315 = dma.done.wait [#allocation4], 256  }
 0x1b5   :  { %316 = vsyncadd [#allocation4], 4294967040 }
 0x1b6   :  { %188 = vsyncpa [#allocation3], 1 }
 0x1b7   :  { %189 = vsyncpa [#allocation6], 1 }
 0x1b8   :  { %190 = vsyncpa [#allocation4], 1 }

// kernel: tpu_custom_call.1
= control target key start
LH: loop header
LB: loop body
LE: loop exit
PB: predicated region body
PF: predicated region fallthrough
CT: control target
= control target key end

     0   :  { %7 = vsyncpa [#allocation3], 0  ;;  %s356_s0 = inlined_call_operand.hbm [shape: f32[2,16], index: 0, kind: input, shape index: {}]   ;;  %s357_s1 = inlined_call_operand.hbm [shape: f32[320,128], index: 1, kind: input, shape index: {}]   ;;  %s358_s2 = inlined_call_operand.hbm [shape: f32[2,4], index: 2, kind: output, shape index: {}]  }
   0x1   :  { %8 = vsyncpa [#allocation6], 0 }
   0x2   :  { %9 = vsyncpa [#allocation4], 0 }
   0x3   :  { %13 = vsyncadd [#allocation3], 224  ;;  %s14_s11 = sshll.u32 %s356_s0, 4  ;;  %s317_s12 = smov [#allocation2]   ;;  %s15_s11 = int_to_ptr.hbm [resolvable:$true] %s14_s11 }
   0x4   :  { %s16_s13 = sshll.u32 %s317_s12, 4  ;;  %s27_s16 = sshll.u32 %s357_s1, 4  ;;  %s17_s13 = int_to_ptr.vmem [resolvable:$true] %s16_s13  ;;  %s28_s16 = int_to_ptr.hbm [resolvable:$true] %s27_s16 }
   0x5   :  { %s318_s17 = smov 32   ;;  %s319_s18 = smov 2  }
   0x6   :  { %22 = dma.hbm_to_vmem [thread:$0]  %s15_s11, 32, %s17_s13, [#allocation3], %s318_s17, %s318_s17, %s319_s18  }
   0x7   :  { %s320_s19 = smov [#allocation5]   ;;  %s321_s21 = smov 128  }
   0x8   :  { %s29_s20 = sshll.u32 %s320_s19, 4  ;;  %s322_s0 = smov 8   ;;  %s30_s20 = int_to_ptr.vmem [resolvable:$true] %s29_s20 }
   0x9   :  { %35 = dma.hbm_to_vmem [thread:$0]  %s28_s16, 5120, %s30_s20, [#allocation6], %s321_s21, %s321_s21, %s322_s0  }
   0xa   :  { %311 = dma.done.wait [#allocation3], 256  }
   0xb   :  { %312 = vsyncadd [#allocation3], 4294967040 }
   0xc   :  { %313 = dma.done.wait [#allocation6], 5120  }
   0xd   :  { %314 = vsyncadd [#allocation6], 4294962176  ;;  %v47_v0 = vld [vmem:[#allocation5 + $0x8] sm:$0xff]  ;;  %v46_v1 = vld [vmem:[#allocation5] sm:$0xff]  ;;  %vm84_vm0 = vcmask 130048   ;;  %vm168_vm1 = vcmask 31744  }
   0xe   :  { %105 = vmatpush.msra.mxu0 %v47_v0  ;;  %v44_v2 = vld [vmem:[#allocation2] sm:$0xff]  ;;  %v63_v3 = vld [vmem:[#allocation5 + $0x88] sm:$0xff]  ;;  %v62_v4 = vld [vmem:[#allocation5 + $0x80] sm:$0xff] }
   0xf   :  { %117 = vmatpush.msra.mxu1 %v63_v3  ;;  %193 = vmatpush.msra.mxu3 %v63_v3  ;;  %v61_v5 = vld [vmem:[#allocation5 + $0x78] sm:$0xff]  ;;  %v60_v6 = vld [vmem:[#allocation5 + $0x70] sm:$0xff]  ;;  %v59_v7 = vld [vmem:[#allocation5 + $0x68] sm:$0xff] }
  0x10   :  { %106 = vmatpush.msra.mxu0 %v46_v1  ;;  %v45_v8 = vld [vmem:[#allocation2 + $0x8] sm:$0xff]  ;;  %v58_v9 = vld [vmem:[#allocation5 + $0x60] sm:$0xff]  ;;  %v56_v11 = vld [vmem:[#allocation5 + $0x50] sm:$0xff] }
  0x11   :  { %191 = vmatmul.msk.f32.vlgmr.msra.gmra.mxu0 %vm84_vm0, %v44_v2  ;;  %118 = vmatpush.msra.mxu1 %v62_v4  ;;  %v57_v10 = vld [vmem:[#allocation5 + $0x58] sm:$0xff]  ;;  %v55_v12 = vld [vmem:[#allocation5 + $0x48] sm:$0xff]  ;;  %v54_v13 = vld [vmem:[#allocation5 + $0x40] sm:$0xff] }
  0x12   :  { %194 = vmatpush.msra.mxu3 %v62_v4  ;;  %v53_v14 = vld [vmem:[#allocation5 + $0x38] sm:$0xff]  ;;  %v52_v15 = vld [vmem:[#allocation5 + $0x30] sm:$0xff]  ;;  %v51_v16 = vld [vmem:[#allocation5 + $0x28] sm:$0xff] }
  0x13   :  { %119 = vmatpush.msra.mxu1 %v61_v5  ;;  %v50_v17 = vld [vmem:[#allocation5 + $0x20] sm:$0xff]  ;;  %v49_v18 = vld [vmem:[#allocation5 + $0x18] sm:$0xff]  ;;  %v48_v19 = vld [vmem:[#allocation5 + $0x10] sm:$0xff] }
  0x14   :  { %195 = vmatpush.msra.mxu3 %v61_v5  ;;  %v79_v20 = vld [vmem:[#allocation5 + $0x108] sm:$0xff]  ;;  %v78_v21 = vld [vmem:[#allocation5 + $0x100] sm:$0xff]  ;;  %v77_v22 = vld [vmem:[#allocation5 + $0xf8] sm:$0xff] }
  0x15   :  { %120 = vmatpush.msra.mxu1 %v60_v6  ;;  %143 = vmatpush.msrb.mxu0 %v79_v20  ;;  %v76_v23 = vld [vmem:[#allocation5 + $0xf0] sm:$0xff]  ;;  %v75_v24 = vld [vmem:[#allocation5 + $0xe8] sm:$0xff]  ;;  %v74_v25 = vld [vmem:[#allocation5 + $0xe0] sm:$0xff] }
  0x16   :  { %196 = vmatpush.msra.mxu3 %v60_v6  ;;  %209 = vmatpush.msra.mxu2 %v79_v20  ;;  %v73_v26 = vld [vmem:[#allocation5 + $0xd8] sm:$0xff]  ;;  %v72_v27 = vld [vmem:[#allocation5 + $0xd0] sm:$0xff]  ;;  %v71_v28 = vld [vmem:[#allocation5 + $0xc8] sm:$0xff] }
  0x17   :  { %121 = vmatpush.msra.mxu1 %v59_v7  ;;  %144 = vmatpush.msrb.mxu0 %v78_v21  ;;  %v232_v29 = vld [vmem:[#allocation5 + $0x110] ss:$0 sm:$0xff]  ;;  %v70_v30 = vld [vmem:[#allocation5 + $0xc0] sm:$0xff]  ;;  %v69_v31 = vld [vmem:[#allocation5 + $0xb8] sm:$0xff] }
  0x18   :  { %197 = vmatpush.msra.mxu3 %v59_v7  ;;  %210 = vmatpush.msra.mxu2 %v78_v21  ;;  %v68_v34 = vld [vmem:[#allocation5 + $0xb0] sm:$0xff]  ;;  %v67_v36 = vld [vmem:[#allocation5 + $0xa8] sm:$0xff]  ;;  %v66_v40 = vld [vmem:[#allocation5 + $0xa0] sm:$0xff] }
  0x19   :  { %192 = vmatmul.msk.f32.gmra.mxu0 %vm84_vm0, %v45_v8  ;;  %122 = vmatpush.msra.mxu1 %v58_v9  ;;  %v65_v41 = vld [vmem:[#allocation5 + $0x98] sm:$0xff]  ;;  %v64_v42 = vld [vmem:[#allocation5 + $0x90] sm:$0xff]  ;;  %v233_v43 = vld [vmem:[#allocation5 + $0x120] ss:$0 sm:$0xff] }
  0x1a   :  { %198 = vmatpush.msra.mxu3 %v58_v9  ;;  %145 = vmatpush.msrb.mxu0 %v77_v22  ;;  %v234_v50 = vld [vmem:[#allocation5 + $0x130] ss:$0 sm:$0xff] }
  0x1b   :  { %123 = vmatpush.msra.mxu1 %v57_v10  ;;  %211 = vmatpush.msra.mxu2 %v77_v22 }
  0x1c   :  { %199 = vmatpush.msra.mxu3 %v57_v10  ;;  %146 = vmatpush.msrb.mxu0 %v76_v23 }
  0x1d   :  { %124 = vmatpush.msra.mxu1 %v56_v11  ;;  %212 = vmatpush.msra.mxu2 %v76_v23 }
  0x1e   :  { %200 = vmatpush.msra.mxu3 %v56_v11  ;;  %147 = vmatpush.msrb.mxu0 %v75_v24 }
  0x1f   :  { %125 = vmatpush.msra.mxu1 %v55_v12  ;;  %213 = vmatpush.msra.mxu2 %v75_v24 }
  0x20   :  { %201 = vmatpush.msra.mxu3 %v55_v12  ;;  %148 = vmatpush.msrb.mxu0 %v74_v25 }
  0x21   :  { %126 = vmatpush.msra.mxu1 %v54_v13  ;;  %214 = vmatpush.msra.mxu2 %v74_v25 }
  0x22   :  { %202 = vmatpush.msra.mxu3 %v54_v13  ;;  %149 = vmatpush.msrb.mxu0 %v73_v26 }
  0x23   :  { %127 = vmatpush.msra.mxu1 %v53_v14  ;;  %215 = vmatpush.msra.mxu2 %v73_v26 }
  0x24   :  { %203 = vmatpush.msra.mxu3 %v53_v14  ;;  %150 = vmatpush.msrb.mxu0 %v72_v27 }
  0x25   :  { %128 = vmatpush.msra.mxu1 %v52_v15  ;;  %216 = vmatpush.msra.mxu2 %v72_v27 }
  0x26   :  { %204 = vmatpush.msra.mxu3 %v52_v15  ;;  %151 = vmatpush.msrb.mxu0 %v71_v28 }
  0x27   :  { %129 = vmatpush.msra.mxu1 %v51_v16  ;;  %217 = vmatpush.msra.mxu2 %v71_v28 }
  0x28   :  { %205 = vmatpush.msra.mxu3 %v51_v16  ;;  %152 = vmatpush.msrb.mxu0 %v70_v30 }
  0x29   :  { %130 = vmatpush.msra.mxu1 %v50_v17  ;;  %218 = vmatpush.msra.mxu2 %v70_v30 }
  0x2a   :  { %206 = vmatpush.msra.mxu3 %v50_v17  ;;  %153 = vmatpush.msrb.mxu0 %v69_v31 }
  0x2b   :  { %131 = vmatpush.msra.mxu1 %v49_v18  ;;  %219 = vmatpush.msra.mxu2 %v69_v31 }
  0x2c   :  { %207 = vmatpush.msra.mxu3 %v49_v18  ;;  %154 = vmatpush.msrb.mxu0 %v68_v34 }
  0x2d   :  { %132 = vmatpush.msra.mxu1 %v48_v19  ;;  %220 = vmatpush.msra.mxu2 %v68_v34 }
  0x2e   :  { %208 = vmatpush.msra.mxu3 %v48_v19  ;;  %155 = vmatpush.msrb.mxu0 %v67_v36 }
  0x2f   :  { %221 = vmatpush.msra.mxu2 %v67_v36 }
  0x30   :  { %156 = vmatpush.msrb.mxu0 %v66_v40 }
  0x31   :  { %222 = vmatpush.msra.mxu2 %v66_v40 }
  0x32   :  { %157 = vmatpush.msrb.mxu0 %v65_v41 }
  0x33   :  { %223 = vmatpush.msra.mxu2 %v65_v41 }
  0x34   :  { %158 = vmatpush.msrb.mxu0 %v64_v42 }
  0x35   :  { %224 = vmatpush.msra.mxu2 %v64_v42 }
  0x8e   :  { %v108_v32 = vpop.f32.mrf.mxu0 }
  0x8f   :  { %v109_v33 = vadd.f32 %v232_v29, %v108_v32 }
  0x91   :  { %v114_v35 = vmax.f32 %v109_v33, 0.0 }
  0x93   :  { %133 = vmatmul.f32.vlgmr.msra.gmra.mxu1 %v114_v35 }
  0x96   :  { %v111_v37 = vpop.f32.mrf.mxu0 }
  0x97   :  { %v112_v38 = vadd.f32 %v232_v29, %v111_v37 }
  0x99   :  { %v115_v39 = vmax.f32 %v112_v38, 0.0 }
  0x9b   :  { %136 = vmatmul.f32.vlgmr.msra.gmra.mxu3 %v115_v39 }
 0x110   :  { %v134_v44 = vpop.f32.mrf.mxu1 }
 0x111   :  { %v135_v45 = vadd.f32 %v233_v43, %v134_v44 }
 0x113   :  { %v140_v46 = vmax.f32 %v135_v45, 0.0 }
 0x115   :  { %159 = vmatmul.f32.vlgmr.msrb.gmra.mxu0 %v140_v46 }
 0x11e   :  { %v137_v47 = vpop.f32.mrf.mxu3 }
 0x11f   :  { %v138_v48 = vadd.f32 %v233_v43, %v137_v47 }
 0x121   :  { %v141_v49 = vmax.f32 %v138_v48, 0.0 }
 0x123   :  { %162 = vmatmul.f32.vlgmr.msra.gmra.mxu2 %v141_v49 }
 0x192   :  { %v160_v51 = vpop.f32.mrf.mxu0 }
 0x193   :  { %v161_v52 = vadd.f32 %v234_v50, %v160_v51 }
 0x195   :  { %235 = vtanh.f32 %v161_v52 }
 0x19b   :  { %v236_v53 = vpop.eup %235 }
 0x19c   :  { %169 = vst.msk [vmem:[#allocation7] sm:$0xff] %vm168_vm1, %v236_v53 }
 0x1a6   :  { %v163_v54 = vpop.f32.mrf.mxu2 }
 0x1a7   :  { %v164_v55 = vadd.f32 %v234_v50, %v163_v54 }
 0x1a9   :  { %237 = vtanh.f32 %v164_v55 }
 0x1af   :  { %v238_v56 = vpop.eup %237 }
 0x1b0   :  { %170 = vst.msk [vmem:[#allocation7 + $0x8] sm:$0xff] %vm168_vm1, %v238_v56 }
 0x1b1   :  { %174 = vsyncadd [#allocation4], 224  ;;  %s177_s23 = sshll.u32 %s358_s2, 4  ;;  %s323_s24 = smov [#allocation7]   ;;  %s178_s23 = int_to_ptr.hbm [resolvable:$true] %s177_s23 }
 0x1b2   :  { %s175_s25 = sshll.u32 %s323_s24, 4  ;;  %s176_s25 = int_to_ptr.vmem [resolvable:$true] %s175_s25 }
 0x1b3   :  { %183 = dma.vmem_to_hbm [thread:$0]  %s176_s25, 32, %s178_s23, [#allocation4], %s318_s17, %s318_s17, %s319_s18  }
 0x1b4   :  { %315 = dma.done.wait [#allocation4], 256  }
 0x1b5   :  { %316 = vsyncadd [#allocation4], 4294967040 }
 0x1b6   :  { %188 = vsyncpa [#allocation3], 1 }
 0x1b7   :  { %189 = vsyncpa [#allocation6], 1 }
 0x1b8   :  { %190 = vsyncpa [#allocation4], 1 }

</bundles_post_ra>
